<compile_context>
chip_gen: v5e
topology: v5e:2x2
jax: 0.10.0
libtpu: 0.0.40
codegen_flags: <defaults>
</compile_context>

<pallas_src>
import functools
import math

import jax
import jax.numpy as jnp
from jax import lax
from jax.experimental import pallas as pl
from jax.experimental.pallas import tpu as pltpu


# ----------------------------------------------------------------------------
# Kernel 1: fused Linear projection + RoPE on the flattened (tL, C) slab.
# ----------------------------------------------------------------------------
def proj_rope_kernel(x_ref, w_ref, b_ref, cos_ref, snext_ref, sprev_ref, o_ref, *,
                     num_heads):
    # x_ref:     (tL, hidden)   activations
    # w_ref:     (hidden, C)    projection weight, C = 2*D*H
    # b_ref:     (1, C)         projection bias
    # cos_ref:   (tL, 2D)       cos(pos * theta_{f//2}),  f = lane % D
    # snext_ref: (tL, 2D)       -sin(...) at even f, 0 at odd f   (multiplies x[c+1])
    # sprev_ref: (tL, 2D)       +sin(...) at odd f,  0 at even f  (multiplies x[c-1])
    # o_ref:     (tL, C)
    p = jnp.dot(x_ref[...], w_ref[...], preferred_element_type=jnp.float32)
    p = p + b_ref[...]                                             # (tL, C)

    # Tile the single-head-chunk tables across all H [q|k] chunks (lane concat, once per block).
    cos_t = jnp.concatenate([cos_ref[...]] * num_heads, axis=-1)   # (tL, C)
    s_nxt = jnp.concatenate([snext_ref[...]] * num_heads, axis=-1)
    s_prv = jnp.concatenate([sprev_ref[...]] * num_heads, axis=-1)

    C = p.shape[-1]
    # roll(p, s)[c] = p[(c - s) mod C]; wraparound lanes always land on zero table entries.
    p_next = pltpu.roll(p, shift=C - 1, axis=1)                    # p[c + 1]
    p_prev = pltpu.roll(p, shift=1, axis=1)                        # p[c - 1]

    o_ref[...] = (p * cos_t + p_next * s_nxt + p_prev * s_prv).astype(o_ref.dtype)


# ----------------------------------------------------------------------------
# Kernel 2: per-(batch, head) q @ k^T + pad/tril masking + 1/sqrt(D) scale.
# ----------------------------------------------------------------------------
def logits_kernel(qk_ref, mask_ref, o_ref, *, proj_dim):
    # qk_ref:   (L, 2D)  [q | k] chunk for one (batch, head), RoPE already applied
    # mask_ref: (1, L)   int32 attention mask row for this batch
    # o_ref:    (L, L)
    # TODO(synk): tile the (m, n) axes for long sequences; L is small here so one block is used.
    D = proj_dim
    qk = qk_ref[...]
    q = qk[:, :D]
    k = qk[:, D:]
    s = jnp.einsum("md,nd->mn", q, k, preferred_element_type=jnp.float32)   # (L, L)

    L = s.shape[0]
    m_idx = lax.broadcasted_iota(jnp.int32, (L, L), 0)
    n_idx = lax.broadcasted_iota(jnp.int32, (L, L), 1)
    keep = (mask_ref[...] > 0) & (m_idx <= n_idx)     # pad mask on n; tril(diag=-1) masks m > n
    scale = 1.0 / math.sqrt(D)
    o_ref[...] = jnp.where(keep, s * scale, -jnp.inf)


# ----------------------------------------------------------------------------
# Wrapper
# ----------------------------------------------------------------------------
def _rope_tables(L, D):
    """(L, 2D) tables covering one [q | k] head chunk; pair-swap sign folded in."""
    pos = jnp.arange(L, dtype=jnp.float32)[:, None]                 # (L, 1)
    lane = jnp.arange(2 * D)
    f = lane % D                                                    # feature index inside q or k
    theta = jnp.power(10000.0, -2.0 * (f // 2).astype(jnp.float32) / D)
    ang = pos * theta[None, :]                                      # (L, 2D)
    cos_t = jnp.cos(ang)
    sin_t = jnp.sin(ang)
    even = (f % 2) == 0
    s_next = jnp.where(even[None, :], -sin_t, 0.0)                  # multiplies x[c + 1]
    s_prev = jnp.where(even[None, :], 0.0, sin_t)                   # multiplies x[c - 1]
    return cos_t, s_next, s_prev


def _pick_seq_tile(L):
    # Largest power-of-two multiple of 8 (<= 512) dividing L, else the whole sequence.
    for cand in (512, 256, 128, 64, 32, 16, 8):
        if L % cand == 0:
            return cand
    return L


def global_ptr_head_forward(hidden_states, attention_mask, w, b, *, num_labels, proj_dim):
    """Pallas forward for GlobalPtrHead (labels=None path). Returns logits (B, H, L, L)."""
    B, L, hidden = hidden_states.shape
    H, D = num_labels, proj_dim
    C = 2 * D * H
    assert w.shape == (hidden, C) and b.shape == (C,)
    assert D % 2 == 0

    cos_t, s_next, s_prev = _rope_tables(L, D)
    b2 = b.reshape(1, C)

    tL = _pick_seq_tile(L)
    grid1 = (B, L // tL)

    cost1 = pl.CostEstimate(
        flops=2 * B * L * hidden * C + 5 * B * L * C,
        transcendentals=0,
        bytes_accessed=4 * (B * L * hidden + hidden * C + C + 3 * L * 2 * D + B * L * C),
    )
    qk = pl.pallas_call(
        functools.partial(proj_rope_kernel, num_heads=H),
        out_shape=jax.ShapeDtypeStruct((B, L, C), jnp.float32),
        grid_spec=pl.GridSpec(
            grid=grid1,
            in_specs=[
                pl.BlockSpec((None, tL, hidden), lambda bi, li: (bi, li, 0)),
                pl.BlockSpec((hidden, C), lambda bi, li: (0, 0)),
                pl.BlockSpec((1, C), lambda bi, li: (0, 0)),
                pl.BlockSpec((tL, 2 * D), lambda bi, li: (li, 0)),
                pl.BlockSpec((tL, 2 * D), lambda bi, li: (li, 0)),
                pl.BlockSpec((tL, 2 * D), lambda bi, li: (li, 0)),
            ],
            out_specs=pl.BlockSpec((None, tL, C), lambda bi, li: (bi, li, 0)),
        ),
        compiler_params=pltpu.CompilerParams(
            dimension_semantics=("parallel", "parallel")),
        cost_estimate=cost1,
    )(hidden_states, w, b2, cos_t, s_next, s_prev)

    mask3 = attention_mask.reshape(B, 1, L).astype(jnp.int32)
    cost2 = pl.CostEstimate(
        flops=2 * B * H * L * L * D + 4 * B * H * L * L,
        transcendentals=0,
        bytes_accessed=4 * (B * L * C + B * L + B * H * L * L),
    )
    logits = pl.pallas_call(
        functools.partial(logits_kernel, proj_dim=D),
        out_shape=jax.ShapeDtypeStruct((B, H, L, L), jnp.float32),
        grid_spec=pl.GridSpec(
            grid=(B, H),
            in_specs=[
                pl.BlockSpec((None, L, 2 * D), lambda bi, hi: (bi, 0, hi)),
                pl.BlockSpec((None, 1, L), lambda bi, hi: (bi, 0, 0)),
            ],
            out_specs=pl.BlockSpec((None, None, L, L), lambda bi, hi: (bi, hi, 0, 0)),
        ),
        compiler_params=pltpu.CompilerParams(
            dimension_semantics=("parallel", "parallel")),
        cost_estimate=cost2,
    )(qk, mask3)

    # TODO(synk): GlobalPtrLoss (labels branch) and the NEROutputs wrapper have no definition in
    # the spec; only the logits forward pass (labels=None) is translated.
    return logits


# ----------------------------------------------------------------------------
# Pure-JAX reference mirroring the PyTorch module exactly (labels=None path).
# ----------------------------------------------------------------------------
def global_ptr_head_ref(hidden_states, attention_mask, w, b, *, num_labels, proj_dim):
    B, L, _ = hidden_states.shape
    H, D = num_labels, proj_dim
    hi = lax.Precision.HIGHEST
    proj = jnp.einsum("blf,fc->blc", hidden_states, w, precision=hi) + b
    proj = proj.reshape(B, L, H, 2 * D)
    qs, ks = proj[..., :D], proj[..., D:]

    pos = jnp.arange(L, dtype=jnp.float32)[:, None]
    idx = jnp.arange(D // 2, dtype=jnp.float32)
    theta = jnp.power(10000.0, -2.0 * idx / D)
    ang = pos * theta                                              # (L, D//2)
    cos_pos = jnp.repeat(jnp.cos(ang), 2, axis=-1)[None, :, None, :]
    sin_pos = jnp.repeat(jnp.sin(ang), 2, axis=-1)[None, :, None, :]

    def rope(t):
        t2 = jnp.stack([-t[..., 1::2], t[..., 0::2]], axis=-1).reshape(t.shape)
        return t * cos_pos + t2 * sin_pos

    qs, ks = rope(qs), rope(ks)
    logits = jnp.einsum("bmhd,bnhd->bhmn", qs, ks, precision=hi)
    pad = attention_mask[:, None, None, :] > 0                     # (B, 1, 1, L)
    logits = jnp.where(pad, logits, -jnp.inf)
    m = jnp.arange(L)[:, None]
    n = jnp.arange(L)[None, :]
    logits = jnp.where(m > n, -jnp.inf, logits)
    return logits / math.sqrt(D)


if __name__ == "__main__":
    key = jax.random.PRNGKey(0)
    B, L = 2, 8
    hidden_size = 32
    num_labels = 2            # H
    proj_dim = 64             # D (module default); 2*D*H = 256 -> lane-dense last dim
    C = 2 * proj_dim * num_labels

    kx, kw, kb = jax.random.split(key, 3)
    hidden_states = jax.random.normal(kx, (B, L, hidden_size), dtype=jnp.float32)
    w = jax.random.normal(kw, (hidden_size, C), dtype=jnp.float32) * 0.1
    b = jax.random.normal(kb, (C,), dtype=jnp.float32) * 0.1
    lengths = jnp.array([L - 2, L], dtype=jnp.int32)
    attention_mask = (jnp.arange(L)[None, :] < lengths[:, None]).astype(jnp.int32)  # (B, L)

    logits = global_ptr_head_forward(hidden_states, attention_mask, w, b,
                                     num_labels=num_labels, proj_dim=proj_dim)
    logits = jax.block_until_ready(logits)

    ref = global_ptr_head_ref(hidden_states, attention_mask, w, b,
                              num_labels=num_labels, proj_dim=proj_dim)
    assert logits.shape == ref.shape == (B, num_labels, L, L)
    assert logits.dtype == ref.dtype

    finite = jnp.isfinite(ref)
    assert bool(jnp.all(jnp.isfinite(logits) == finite)), "mask (-inf) pattern mismatch"
    got = jnp.where(finite, logits, 0.0)
    want = jnp.where(finite, ref, 0.0)
    # Tolerance accommodates possible MXU f32 pass-count differences between Pallas and XLA.
    assert bool(jnp.allclose(got, want, rtol=5e-3, atol=5e-3)), "value mismatch vs reference"

    print("KERNEL_OK")
</pallas_src>

<mosaic_0001>
module attributes {stable_mosaic.version = 11 : i64} {
  func.func @proj_rope_kernel(%arg0: i32, %arg1: i32, %arg2: memref<1x8x32xf32, #tpu.memory_space<vmem>>, %arg3: memref<32x256xf32, #tpu.memory_space<vmem>>, %arg4: memref<1x256xf32, #tpu.memory_space<vmem>>, %arg5: memref<8x128xf32, #tpu.memory_space<vmem>>, %arg6: memref<8x128xf32, #tpu.memory_space<vmem>>, %arg7: memref<8x128xf32, #tpu.memory_space<vmem>>, %arg8: memref<1x8x256xf32, #tpu.memory_space<vmem>>) attributes {dimension_semantics = [#tpu.dimension_semantics<parallel>, #tpu.dimension_semantics<parallel>], iteration_bounds = array<i64: 2, 1>, scalar_prefetch = 0 : i64, scratch_operands = 0 : i64, tpu.core_type = #tpu.core_type<tc>, window_params = [{transform_indices = @transform_0, window_bounds = array<i64: 1, 8, 32>}, {pipeline_mode = #tpu.pipeline_mode<synchronous>, transform_indices = @transform_1, window_bounds = array<i64: 32, 256>}, {pipeline_mode = #tpu.pipeline_mode<synchronous>, transform_indices = @transform_2, window_bounds = array<i64: 1, 256>}, {transform_indices = @transform_3, window_bounds = array<i64: 8, 128>}, {transform_indices = @transform_4, window_bounds = array<i64: 8, 128>}, {transform_indices = @transform_5, window_bounds = array<i64: 8, 128>}, {transform_indices = @transform_6, window_bounds = array<i64: 1, 8, 256>}]} {
    %c0 = arith.constant 0 : index
    %c0_0 = arith.constant 0 : index
    %c0_1 = arith.constant 0 : index
    %0 = vector.load %arg2[%c0, %c0_0, %c0_1] : memref<1x8x32xf32, #tpu.memory_space<vmem>>, vector<1x8x32xf32>
    %1 = vector.shape_cast %0 : vector<1x8x32xf32> to vector<8x32xf32>
    %c0_2 = arith.constant 0 : index
    %c0_3 = arith.constant 0 : index
    %2 = vector.load %arg3[%c0_2, %c0_3] : memref<32x256xf32, #tpu.memory_space<vmem>>, vector<32x256xf32>
    %cst = arith.constant dense<0.000000e+00> : vector<8x256xf32>
    %3 = tpu.matmul %1, %2, %cst {dimension_numbers = #tpu.dot_dimension_numbers<[1], [0], [0], [1], [0, 0, 1, 1], [], []>} : vector<8x32xf32>, vector<32x256xf32>, vector<8x256xf32> -> vector<8x256xf32>
    %c0_4 = arith.constant 0 : index
    %c0_5 = arith.constant 0 : index
    %4 = vector.load %arg4[%c0_4, %c0_5] : memref<1x256xf32, #tpu.memory_space<vmem>>, vector<1x256xf32>
    %5 = vector.broadcast %4 : vector<1x256xf32> to vector<8x256xf32>
    %6 = arith.addf %3, %5 : vector<8x256xf32>
    %c0_6 = arith.constant 0 : index
    %c0_7 = arith.constant 0 : index
    %7 = vector.load %arg5[%c0_6, %c0_7] : memref<8x128xf32, #tpu.memory_space<vmem>>, vector<8x128xf32>
    %8 = tpu.concatenate %7, %7 in 1 : vector<8x128xf32>, vector<8x128xf32> -> vector<8x256xf32>
    %c0_8 = arith.constant 0 : index
    %c0_9 = arith.constant 0 : index
    %9 = vector.load %arg6[%c0_8, %c0_9] : memref<8x128xf32, #tpu.memory_space<vmem>>, vector<8x128xf32>
    %10 = tpu.concatenate %9, %9 in 1 : vector<8x128xf32>, vector<8x128xf32> -> vector<8x256xf32>
    %c0_10 = arith.constant 0 : index
    %c0_11 = arith.constant 0 : index
    %11 = vector.load %arg7[%c0_10, %c0_11] : memref<8x128xf32, #tpu.memory_space<vmem>>, vector<8x128xf32>
    %12 = tpu.concatenate %11, %11 in 1 : vector<8x128xf32>, vector<8x128xf32> -> vector<8x256xf32>
    %c255_i32 = arith.constant 255 : i32
    %13 = tpu.dynamic_rotate %6 by %c255_i32 dim 1 : vector<8x256xf32>, i32 -> vector<8x256xf32>
    %c1_i32 = arith.constant 1 : i32
    %14 = tpu.dynamic_rotate %6 by %c1_i32 dim 1 : vector<8x256xf32>, i32 -> vector<8x256xf32>
    %15 = arith.mulf %6, %8 : vector<8x256xf32>
    %16 = arith.mulf %13, %10 : vector<8x256xf32>
    %17 = arith.addf %15, %16 : vector<8x256xf32>
    %18 = arith.mulf %14, %12 : vector<8x256xf32>
    %19 = arith.addf %17, %18 : vector<8x256xf32>
    %c0_12 = arith.constant 0 : index
    %c0_13 = arith.constant 0 : index
    %c0_14 = arith.constant 0 : index
    %20 = vector.load %arg8[%c0_12, %c0_13, %c0_14] : memref<1x8x256xf32, #tpu.memory_space<vmem>>, vector<1x8x256xf32>
    %21 = vector.shape_cast %20 : vector<1x8x256xf32> to vector<8x256xf32>
    %22 = vector.shape_cast %19 : vector<8x256xf32> to vector<1x8x256xf32>
    tpu.vector_store %arg8[%c0_12, %c0_13, %c0_14], %22 {strides = array<i32>} : memref<1x8x256xf32, #tpu.memory_space<vmem>>, vector<1x8x256xf32>,
    return
  }
  func.func @transform_0(%arg0: i32, %arg1: i32) -> (i32, i32, i32) {
    %c0_i32 = arith.constant 0 : i32
    %c0_i32_0 = arith.constant 0 : i32
    return %arg0, %arg1, %c0_i32 : i32, i32, i32
  }
  func.func @transform_1(%arg0: i32, %arg1: i32) -> (i32, i32) {
    %c0_i32 = arith.constant 0 : i32
    %c0_i32_0 = arith.constant 0 : i32
    %c0_i32_1 = arith.constant 0 : i32
    return %c0_i32, %c0_i32_0 : i32, i32
  }
  func.func @transform_2(%arg0: i32, %arg1: i32) -> (i32, i32) {
    %c0_i32 = arith.constant 0 : i32
    %c0_i32_0 = arith.constant 0 : i32
    %c0_i32_1 = arith.constant 0 : i32
    return %c0_i32, %c0_i32_0 : i32, i32
  }
  func.func @transform_3(%arg0: i32, %arg1: i32) -> (i32, i32) {
    %c0_i32 = arith.constant 0 : i32
    %c0_i32_0 = arith.constant 0 : i32
    return %arg1, %c0_i32 : i32, i32
  }
  func.func @transform_4(%arg0: i32, %arg1: i32) -> (i32, i32) {
    %c0_i32 = arith.constant 0 : i32
    %c0_i32_0 = arith.constant 0 : i32
    return %arg1, %c0_i32 : i32, i32
  }
  func.func @transform_5(%arg0: i32, %arg1: i32) -> (i32, i32) {
    %c0_i32 = arith.constant 0 : i32
    %c0_i32_0 = arith.constant 0 : i32
    return %arg1, %c0_i32 : i32, i32
  }
  func.func @transform_6(%arg0: i32, %arg1: i32) -> (i32, i32, i32) {
    %c0_i32 = arith.constant 0 : i32
    %c0_i32_0 = arith.constant 0 : i32
    return %arg0, %arg1, %c0_i32 : i32, i32, i32
  }
}

</mosaic_0001>

<bundles_post_ra>
// kernel: tpu_custom_call.1
= control target key start
LH: loop header
LB: loop body
LE: loop exit
PB: predicated region body
PF: predicated region fallthrough
CT: control target
= control target key end

     0   :  { %s1273_s0 = inlined_call_operand.hbm [shape: f32[2,8,32], index: 0, kind: input, shape index: {}]   ;;  %s1274_s1 = inlined_call_operand.hbm [shape: f32[32,256], index: 1, kind: input, shape index: {}]   ;;  %s1275_s2 = inlined_call_operand.hbm [shape: f32[1,256], index: 2, kind: input, shape index: {}]   ;;  %s1276_s3 = inlined_call_operand.hbm [shape: f32[8,128], index: 3, kind: input, shape index: {}]   ;;  %s1277_s4 = inlined_call_operand.hbm [shape: f32[8,128], index: 4, kind: input, shape index: {}]   ;;  %s1278_s5 = inlined_call_operand.hbm [shape: f32[8,128], index: 5, kind: input, shape index: {}]   ;;  %s1279_s6 = inlined_call_operand.hbm [shape: f32[2,8,256], index: 6, kind: output, shape index: {}]  }
   0x1   :  { %1280 = sst [smem:[#allocation19_spill]] %s1274_s1 }
   0x2   :  { %11 = vsyncpa [#allocation3], 0 }
   0x3   :  { %13 = vsyncpa [#allocation3 + $0x1], 0 }
   0x4   :  { %14 = vsyncpa [#allocation6], 0 }
   0x5   :  { %15 = vsyncpa [#allocation9], 0 }
   0x6   :  { %16 = vsyncpa [#allocation12], 0 }
   0x7   :  { %17 = vsyncpa [#allocation4], 0 }
   0x8   :  { %19 = vsyncpa [#allocation4 + $0x1], 0  ;;  %s1091_s21 = smov 0   ;;  %s1093_s22 = smov 0  }
   0x9   :  { %s1095_s23 = smov 0   ;;  %s1097_s24 = smov 0  }
   0xa   :  { %s1099_s25 = smov 0   ;;  %s1101_s26 = smov 0  }
   0xb LB: > { %s627_s27 = sadd.s32 4294967295, %s1045_s26   ;;  %p629_p0 = scmp.ge.s32.totalorder %s1045_s26, 1  ;;  %s1045_s26 = sphi %s1101_s26, %s25_s26   ;;  %s1041_s25 = sphi %s1099_s25, %s1293_s25   ;;  %s1037_s24 = sphi %s1097_s24, %s1292_s24   ;;  %s1033_s23 = sphi %s1095_s23, %s1291_s23   ;;  %s1029_s22 = sphi %s1093_s22, %s1290_s22   ;;  %s1025_s21 = sphi %s1091_s21, %s1289_s21  }
   0xc   : > { %p1125_p1 = scmp.eq.s32.totalorder %s627_s27, 0  ;;  %p218_p2 = scmp.lt.s32.totalorder %s1045_s26, 3 }
   0xd   : > { %s1282_s1 = sld [smem:[#allocation19_spill]]  ;;  %s1047_s9 = smov [#allocation5]  }
   0xe   : > { %p1133_p3 = pnand %p629_p0, %p218_p2  ;;  %s231_s10 = sshll.u32 %s1047_s9, 4  ;;  %s232_s10 = int_to_ptr.vmem [resolvable:$true] %s231_s10 }
   0xf   : > { %p635_p6 = scmp.ge.s32.totalorder %s1045_s26, 2  ;;  %s258_s14 = sshll.u32 %s1276_s3, 4  ;;  %s259_s14 = int_to_ptr.hbm [resolvable:$true] %s258_s14 }
  0x10   : > { %p678_p4 = pneg %p1133_p3  ;;  %s1048_s15 = smov 256  }
  0x11   : > { %s1049_s16 = smov 16   ;;  %s1050_s17 = smov [#allocation8]  }
  0x12   : > { %p1141_p5 = pnand %p678_p4, %p1125_p1  ;;  %s260_s18 = sshll.u32 %s1050_s17, 4  ;;  %s261_s18 = int_to_ptr.vmem [resolvable:$true] %s260_s18 }
  0x13   : > { %s229_s7 = sshll.u32 %s1282_s1, 4  ;;  %s244_s29 = sshll.u32 %s1275_s2, 4  ;;  %s230_s7 = int_to_ptr.hbm [resolvable:$true] %s229_s7  ;;  %s245_s29 = int_to_ptr.hbm [resolvable:$true] %s244_s29 }
  0x14   : > { %681 = dma.hbm_to_vmem [thread:$0]  (!%p1141_p5), %s230_s7, 1024, %s232_s10, [#allocation6], %s1048_s15, %s1048_s15, %s1049_s16  }
  0x15   : > { %687 = dma.hbm_to_vmem [thread:$0]  (!%p1141_p5), %s259_s14, 128, %s261_s18, [#allocation9]  }
  0x16   : > { %s272_s12 = sshll.u32 %s1277_s4, 4  ;;  %s1051_s13 = smov [#allocation7]   ;;  %s273_s12 = int_to_ptr.hbm [resolvable:$true] %s272_s12 }
  0x17   : > { %s246_s7 = sshll.u32 %s1051_s13, 4  ;;  %s1052_s10 = smov [#allocation10]   ;;  %s247_s7 = int_to_ptr.vmem [resolvable:$true] %s246_s7 }
  0x18   : > { %684 = dma.hbm_to_vmem [thread:$0]  (!%p1141_p5), %s245_s29, 32, %s247_s7, [#allocation6]  }
  0x19   : > { %s274_s14 = sshll.u32 %s1052_s10, 4  ;;  %s286_s17 = sshll.u32 %s1278_s5, 4  ;;  %s275_s14 = int_to_ptr.vmem [resolvable:$true] %s274_s14  ;;  %s287_s17 = int_to_ptr.hbm [resolvable:$true] %s286_s17 }
  0x1a   : > { %690 = dma.hbm_to_vmem [thread:$0]  (!%p1141_p5), %s273_s12, 128, %s275_s14, [#allocation9]  }
  0x1b   : > { %s1053_s18 = smov [#allocation11]   ;;  %s628_s20 = sadd.s32 4294967294, %s1045_s26  }
  0x1c   : > { %s288_s19 = sshll.u32 %s1053_s18, 4  ;;  %s37_s29 = sadd.s32 1, %s1041_s25  ;;  %s289_s19 = int_to_ptr.vmem [resolvable:$true] %s288_s19 }
  0x1d   : > { %693 = dma.hbm_to_vmem [thread:$0]  (!%p1141_p5), %s287_s17, 128, %s289_s19, [#allocation12]  }
  0x1e   : > { %s46_s30 = sadd.s32 1, %s1033_s23  ;;  %p39_p7 = scmp.ge.s32.totalorder %s37_s29, 2 }
  0x1f   : > { %p53_p8 = scmp.ne.s32.totalorder %s1033_s23, %s1029_s22  ;;  %p54_p9 = scmp.eq.s32.totalorder %s1045_s26, 0 }
  0x20   : > { %p59_p10 = scmp.ne.s32.totalorder %s1029_s22, %s1025_s21  ;;  %s1295_s29 = smov (%p39_p7, %s37_s29), 0 }
  0x21   : > { %p1178_p11 = por %p54_p9, %p53_p8  ;;  %s41_s12 = ssub.s32 %s1041_s25, %s1295_s29 }
  0x22   : > { %p1184_p12 = por %p1125_p1, %p59_p10  ;;  %p205_p13 = scmp.eq.s32.totalorder %s627_s27, 1 }
  0x23   : > { %p44_p0 = scmp.eq.s32.totalorder %s41_s12, 0  ;;  %p211_p2 = scmp.eq.s32.totalorder %s628_s20, 1 }
  0x24   : > { %p1192_p4 = por %p205_p13, %p53_p8  ;;  %p707_p5 = scmp.lt.s32.totalorder %s1045_s26, 2 }
  0x25   : > { %s1198_s7 = scalar_select %p44_p0, %s1033_s23, %s46_s30  }
  0x26   : > { %p1200_p7 = por %p211_p2, %p59_p10  ;;  %s299_s14 = sand.u32 1, %s1033_s23  }
  0x27   : > { %s636_s15 = sshll.u32 %s299_s14, 3  ;;  %s637_s16 = sshll.u32 %s1041_s25, 3 }
  0x28   : > { %s308_s27 = scalar_lea.hbm %s1273_s0, %s637_s16  ;;  %s303_s19 = scalar_lea.vmem [#allocation2], %s636_s15 }
  0x29   : > { %s312_s20 = sshll.u32 %s303_s19, 4  ;;  %s310_s12 = sshll.u32 %s308_s27, 4  ;;  %s313_s20 = int_to_ptr.vmem [resolvable:$true] %s312_s20  ;;  %s311_s12 = int_to_ptr.hbm [resolvable:$true] %s310_s12 }
  0x2a   : > { %p695_p8 = pnand %p707_p5, %p1178_p11  ;;  %s300_s30 = scalar_lea.sflag [#allocation3], %s299_s14 }
  0x2b   : > { %321 = sbr.rel (%p1133_p3) target bundleno = 325 (0x145), region = 44  ;;  %s1214_s1 = sand.u32 (!%p1133_p3), 1, %s1029_s22  }
  0x2c   : > { %697 = dma.hbm_to_vmem [thread:$0]  (!%p695_p8), %s311_s12, 128, %s313_s20, %s300_s30  }
  0x2d   : > { %s639_s17 = sshll.u32 (!%p1133_p3), %s1214_s1, 3  ;;  %s324_s16 = scalar_lea.sflag (!%p1133_p3), [#allocation3], %s1214_s1 }
  0x2e   : > { %s327_s15 = scalar_lea.vmem (!%p1133_p3), [#allocation2], %s639_s17 }
  0x30   : > { %1004 = dma.done.wait (%p1184_p12), %s324_s16, 128  }
  0x31   : > { %1006 = vsyncadd (%p1184_p12), %s324_s16, 4294967168 }
  0x32   : > { %1008 = dma.done.wait (%p1125_p1), [#allocation6], 1056  }
  0x33   : > { %1010 = vsyncadd (%p1125_p1), [#allocation6], 4294966240 }
  0x34   : > { %1012 = dma.done.wait (%p1125_p1), [#allocation9], 256  }
  0x35   : > { %1014 = vsyncadd (%p1125_p1), [#allocation9], 4294967040 }
  0x36   : > { %1016 = dma.done.wait (%p1125_p1), [#allocation12], 128  }
  0x37   : > { %1018 = vsyncadd (%p1125_p1), [#allocation12], 4294967168  ;;  %v389_v0 = vld [vmem:[#allocation5 + $0x30] sm:$0xff]  ;;  %v387_v1 = vld [vmem:[#allocation5 + $0x20] sm:$0xff]  ;;  %vm397_vm0 = vcmask 261120   ;;  %s1054_s28 = smov 1   ;;  %v448_v16 = vlaneseq }
  0x38   : > { %413 = vmatpush.msra.mxu0 %v389_v0  ;;  %v390_v2 = vld [vmem:[#allocation5 + $0x38] sm:$0xff]  ;;  %v385_v3 = vld [vmem:[#allocation5 + $0x10] sm:$0xff]  ;;  %v388_v4 = vld [vmem:[#allocation5 + $0x28] sm:$0xff]  ;;  %s1055_s8 = smov 127   ;;  %s645_s9 = sshll.u32 %s1214_s1, 4 }
  0x39   : > { %433 = vmatpush.msra.mxu1 %v390_v2  ;;  %v386_v5 = vld [vmem:[#allocation5 + $0x18] sm:$0xff]  ;;  %v383_v6 = vld [vmem:[#allocation5] sm:$0xff]  ;;  %v384_v8 = vld [vmem:[#allocation5 + $0x8] sm:$0xff]  ;;  %v449_v19 = vand.u32 127, %v448_v16  ;;  %s653_s11 = sshll.u32 %s1037_s24, 4  ;;  %s381_s24 = scalar_lea.vmem [#allocation13], %s645_s9 }
  0x3a   : > { %414 = vmatpush.msra.mxu0 %v387_v1  ;;  %v382_v7 = vld [vmem:[%s327_s15] sm:$0xff]  ;;  %v391_v9 = vld [vmem:[#allocation7] sm:$0x3]  ;;  %v441_v20 = vld [vmem:[#allocation8] sm:$0xff]  ;;  %s486_s27 = scalar_lea.hbm %s1279_s6, %s653_s11  ;;  %s488_s19 = sshll.u32 %s381_s24, 4  ;;  %s489_s19 = int_to_ptr.vmem [resolvable:$true] %s488_s19 }
  0x3b   : > { %434 = vmatpush.msra.mxu1 %v388_v4  ;;  %v393_v10 = vperm.slane %v391_v9, 0  ;;  %v394_v13 = vperm.slane %v391_v9, 1  ;;  %vm457_vm1 = vcmp.lt.s32.totalorder %v449_v19, 1  ;;  %vm450_vm2 = vcmp.lt.s32.totalorder %v449_v19, 127  ;;  %v442_v21 = vld [vmem:[#allocation10] sm:$0xff]  ;;  %v443_v24 = vld [vmem:[#allocation11] sm:$0xff] }
  0x3c   : > { %415 = vmatpush.msra.mxu0 %v385_v3  ;;  %s490_s20 = sshll.u32 %s486_s27, 4  ;;  %s473_s12 = scalar_lea.sflag [#allocation4], %s1214_s1  ;;  %s491_s20 = int_to_ptr.hbm [resolvable:$true] %s490_s20 }
  0x3d   : > { %435 = vmatpush.msra.mxu1 %v386_v5  ;;  %s965_s30 = sshra.s32 %s491_s20, 4  ;;  %s966_s30 = int_to_ptr.hbm [resolvable:$true] %s965_s30 }
  0x3e   : > { %416 = vmatpush.msra.mxu0 %v383_v6  ;;  %s967_s17 = scalar_lea.hbm %s966_s30, 16  ;;  %p972_p10 = scmp.lt.s32.totalorder %s966_s30, %s1279_s6 }
  0x3f   : > { %646 = vmatmul.msk.f32.vlgmr.msra.gmra.mxu0 %vm397_vm0, %v382_v7  ;;  %436 = vmatpush.msra.mxu1 %v384_v8  ;;  %p968_p1 = scmp.ne.s32.totalorder %s966_s30, %s967_s17 }
  0x40   : > { %647 = vmatmul.msk.f32.vlgmr.msra.gmra.mxu1 %vm397_vm0, %v382_v7 }
  0x41   : > { %p969_p3 = pnand %p968_p1, %p1192_p4 }
  0x43   : > { %p970_p9 = pneg %p969_p3 }
  0xbc   : > { %v418_v11 = vpop.f32.mrf.mxu0 }
  0xbd   : > { %v419_v12 = vadd.f32 %v418_v11, %v393_v10  ;;  %v438_v14 = vpop.f32.mrf.mxu1 }
  0xbe   : > { %v439_v15 = vadd.f32 %v438_v14, %v394_v13 }
  0xbf   : > { %453 = vrot.lane.b32.xlu1 %v419_v12, %s1054_s28  ;;  %444 = vrot.lane.b32.xlu0 %v419_v12, %s1055_s8  ;;  %v460_v29 = vmul.f32 %v441_v20, %v419_v12 }
  0xc0   : > { %v461_v30 = vmul.f32 %v441_v20, %v439_v15 }
  0xc7   : > { %455 = vrot.lane.b32.xlu1 %v439_v15, %s1054_s28  ;;  %446 = vrot.lane.b32.xlu0 %v439_v15, %s1055_s8  ;;  %s971_s28 = scalar_lea.hbm %s1279_s6, 32 }
  0xc8   : > { %p973_p11 = scmp.lt.s32.totalorder %s971_s28, %s967_s17 }
  0xca   : > { %p974_p12 = por %p973_p11, %p972_p10 }
  0xcc   : > { %p975_p13 = pnand %p974_p12, %p970_p9 }
 0x131   : > { %v454_v17 = vpop.permute.xlu1 %453  ;;  %v445_v18 = vpop.permute.xlu0 %444 }
 0x139   : > { %v456_v22 = vpop.permute.xlu1 %455  ;;  %v447_v23 = vpop.permute.xlu0 %446 }
 0x13a   : > { %v458_v25 = vsel %vm457_vm1, %v454_v17, %v456_v22  ;;  %v459_v26 = vsel %vm457_vm1, %v456_v22, %v454_v17  ;;  %v451_v27 = vsel %vm450_vm2, %v445_v18, %v447_v23  ;;  %v452_v28 = vsel %vm450_vm2, %v447_v23, %v445_v18 }
 0x13b   : > { %v462_v31 = vmul.f32 %v451_v27, %v442_v21  ;;  %v463_v32 = vmul.f32 %v452_v28, %v442_v21  ;;  %v466_v33 = vmul.f32 %v459_v26, %v443_v24  ;;  %v467_v34 = vmul.f32 %v458_v25, %v443_v24 }
 0x13d   : > { %v464_v35 = vadd.f32 %v462_v31, %v460_v29  ;;  %v465_v36 = vadd.f32 %v463_v32, %v461_v30 }
 0x13f   : > { %v468_v37 = vadd.f32 %v466_v33, %v464_v35  ;;  %v469_v38 = vadd.f32 %v467_v34, %v465_v36 }
 0x141   : > { %470 = vst [vmem:[%s381_s24] sm:$0xff] %v468_v37 }
 0x142   : > { %471 = vst [vmem:[%s381_s24 + $0x8] sm:$0xff] %v469_v38 }
 0x143   : > { %978 = shalt.err (!%p975_p13)
}
 0x144   : > { %676 = dma.vmem_to_hbm [thread:$0]  (%p1192_p4), %s489_s19, 256, %s491_s20, %s473_s12  }
 0x145 PF: > { %s502_s1 = sand.u32 1, %s1025_s21   ;;  %p699_p0 = pnand %p635_p6, %p1200_p7 }
 0x146   : > { %s503_s11 = scalar_lea.sflag [#allocation4], %s502_s1 }
 0x147   : > { %p700_p2 = pneg %p699_p0 }
 0x149   : > { %1020 = dma.done.wait (%p700_p2), %s503_s11, 256  }
 0x14a   : > { %1022 = vsyncadd (%p700_p2), %s503_s11, 4294967040  ;;  %s25_s26 = sadd.s32 1, %s1045_s26   ;;  %s1289_s21 = smov %s1029_s22 }
 0x14b   : > { %p22_p5 = scmp.ge.s32.totalorder %s25_s26, 4   ;;  %s1290_s22 = smov %s1033_s23 }
 0x14c   : > { %s1291_s23 = smov %s1198_s7  ;;  %s1292_s24 = smov %s1041_s25 }
 0x14d   : > { %s1293_s25 = smov %s1295_s29  ;;  %24 = sbr.rel (!%p22_p5) target bundleno = 11 (0xb), region = 112 }
 0x152   :  { %509 = vsyncpa [#allocation3], 1 }
 0x153   :  { %511 = vsyncpa [#allocation3 + $0x1], 1 }
 0x154   :  { %512 = vsyncpa [#allocation6], 1 }
 0x155   :  { %513 = vsyncpa [#allocation9], 1 }
 0x156   :  { %514 = vsyncpa [#allocation12], 1 }
 0x157   :  { %515 = vsyncpa [#allocation4], 1 }
 0x158   :  { %517 = vsyncpa [#allocation4 + $0x1], 1 }

</bundles_post_ra>
